<compile_context>
chip_gen: v7x
topology: tpu7x:2x2x1
jax: 0.10.0
libtpu: 0.0.40
codegen_flags: <defaults>
</compile_context>

<pallas_src>
import functools

import jax
import jax.numpy as jnp
from jax import lax
from jax.experimental import pallas as pl
from jax.experimental.pallas import tpu as pltpu


def netvlad_kernel(x_ref, w_ref, c_ref, out_ref, atx_acc, asum_acc,
                   *, s_true, padded, mm_dtype):
    # x_ref:    (1, C, tS) channel-major spatial tile of one batch element
    # w_ref:    (K, C)     1x1 conv weight (pre-cast to mm_dtype in the wrapper)
    # c_ref:    (K, C)     centroids
    # out_ref:  (1, K, C)  normalized VLAD (written at the last S tile)
    # atx_acc:  (K, C) f32 scratch: sum_s a[k,s] * xn[c,s]
    # asum_acc: (K, 1) f32 scratch: sum_s a[k,s]
    s = pl.program_id(1)
    tS = x_ref.shape[2]

    @pl.when(s == 0)
    def _init():
        atx_acc[...] = jnp.zeros_like(atx_acc)
        asum_acc[...] = jnp.zeros_like(asum_acc)

    x = x_ref[0].astype(jnp.float32)                         # (C, tS)

    # Descriptor-wise L2 normalization over channels. rsqrt(max(ss, eps^2)) is
    # exactly 1 / max(norm, eps) with eps = 1e-12 (matches F.normalize).
    ss = jnp.sum(x * x, axis=0, keepdims=True)               # (1, tS)
    inv = lax.rsqrt(jnp.maximum(ss, 1e-24))                  # (1, tS)
    # Single materialization of the normalized tile, directly in the MXU feed
    # dtype; reused by BOTH contractions below (no duplicate casts / f32 copy).
    xn_mm = (x * inv).astype(mm_dtype)                       # (C, tS)

    # 1x1 conv -> soft-assignment logits (K, tS); softmax over clusters (axis 0).
    logits = lax.dot_general(
        w_ref[...], xn_mm,
        dimension_numbers=(((1,), (0,)), ((), ())),
        preferred_element_type=jnp.float32)                  # (K, tS)
    logits = logits - jnp.max(logits, axis=0, keepdims=True)
    ex = jnp.exp(logits)                                     # f32 exp (v5e-safe)
    a = ex * pl.reciprocal(jnp.sum(ex, axis=0, keepdims=True), approx=True)

    if padded:
        # Zero soft-assignments on zero-padded spatial lanes so they contribute
        # to neither accumulator (padded xn columns are already zero).
        lane = lax.broadcasted_iota(jnp.int32, (1, tS), 1) + s * tS
        a = jnp.where(lane < s_true, a, 0.0)                 # (K, tS)

    # Accumulate A @ Xn^T without materializing any transpose: contract over tS.
    atx_acc[...] += lax.dot_general(
        a.astype(mm_dtype), xn_mm,
        dimension_numbers=(((1,), (1,)), ((), ())),
        preferred_element_type=jnp.float32)                  # (K, C)
    asum_acc[...] += jnp.sum(a, axis=1, keepdims=True)       # (K, 1), f32

    @pl.when(s == pl.num_programs(1) - 1)
    def _finalize():
        # vlad[k,c] = sum_s a[k,s] * xn[c,s]  -  (sum_s a[k,s]) * centroid[k,c]
        vlad = atx_acc[...] - asum_acc[...] * c_ref[...].astype(jnp.float32)
        # intra-normalization over C
        iss = jnp.sum(vlad * vlad, axis=1, keepdims=True)
        vlad = vlad * lax.rsqrt(jnp.maximum(iss, 1e-24))
        # global L2 normalization over the flattened (K*C) vector
        gss = jnp.sum(vlad * vlad)
        vlad = vlad * lax.rsqrt(jnp.maximum(gss, 1e-24))
        out_ref[0] = vlad.astype(out_ref.dtype)


def _pick_s_tile(s_pad, c, itemsize, max_tile_bytes):
    """Largest lane-dense (multiple-of-128) spatial tile dividing s_pad within budget."""
    cap = max(128, ((max_tile_bytes // (c * itemsize)) // 128) * 128)
    t = min(s_pad, cap)
    while s_pad % t != 0:
        t -= 128
    return t


def netvlad_forward(x_nchw, conv_w, centroids, *, use_bf16_mxu=True,
                    max_tile_bytes=2 * 1024 * 1024,
                    vmem_limit_bytes=32 * 1024 * 1024):
    """x_nchw: (N, C, H, W); conv_w: (K, C, 1, 1); centroids: (K, C).

    Returns the flattened, L2-normalized VLAD descriptor of shape (N, K*C),
    matching NetVLAD.forward (normalize_input=True, vladv2=False).

    use_bf16_mxu: feed the MXU bf16 (f32 accumulation) even for f32 activations.
    The final intra+global L2 norms absorb the scale noise; set False for
    full-f32 matmuls when strict parity with the f32 module is required.
    """
    N, C, H, W = x_nchw.shape
    K = conv_w.shape[0]
    S = H * W
    S_pad = ((S + 127) // 128) * 128

    x_ncs = x_nchw.reshape(N, C, S)          # free view; channel-major tiles
    if S_pad != S:
        # Zero-pad spatial lanes to a multiple of 128 so the S axis stays a
        # streamed, pipelined, lane-dense reduction; padded lanes are masked
        # out of the soft-assignments inside the kernel.
        x_ncs = jnp.pad(x_ncs, ((0, 0), (0, 0), (0, S_pad - S)))

    mm_dtype = (jnp.bfloat16
                if (use_bf16_mxu or x_nchw.dtype == jnp.bfloat16)
                else jnp.float32)
    # Pre-cast the 1x1 conv weight once here: no per-grid-step (K,C) cast and
    # half the resident (K,C) VMEM block / DMA on the bf16 path.
    w_mm = conv_w.reshape(K, C).astype(mm_dtype)

    tS = _pick_s_tile(S_pad, C, jnp.dtype(x_nchw.dtype).itemsize, max_tile_bytes)
    n_s_tiles = S_pad // tS

    kernel = functools.partial(
        netvlad_kernel, s_true=S, padded=(S_pad != S), mm_dtype=mm_dtype)

    out = pl.pallas_call(
        kernel,
        out_shape=jax.ShapeDtypeStruct((N, K, C), x_nchw.dtype),
        grid=(N, n_s_tiles),
        in_specs=[
            pl.BlockSpec((1, C, tS), lambda n, s: (n, 0, s)),
            pl.BlockSpec((K, C), lambda n, s: (0, 0)),
            pl.BlockSpec((K, C), lambda n, s: (0, 0)),
        ],
        out_specs=pl.BlockSpec((1, K, C), lambda n, s: (n, 0, 0)),
        scratch_shapes=[
            pltpu.VMEM((K, C), jnp.float32),
            pltpu.VMEM((K, 1), jnp.float32),
        ],
        compiler_params=pltpu.CompilerParams(
            dimension_semantics=("parallel", "arbitrary"),
            vmem_limit_bytes=vmem_limit_bytes,
        ),
    )(x_ncs, w_mm, centroids)

    # (N, K, C) -> (N, K*C): free reshape in the wrapper.
    return out.reshape(N, K * C)


def netvlad_reference(x_nchw, conv_w, centroids):
    """Pure-JAX mirror of the PyTorch forward, for a correctness sanity check."""
    N, C, H, W = x_nchw.shape
    K = conv_w.shape[0]
    x = x_nchw.astype(jnp.float32)
    nrm = jnp.sqrt(jnp.sum(x * x, axis=1, keepdims=True))
    xn = x / jnp.maximum(nrm, 1e-12)
    xf = xn.reshape(N, C, H * W)
    w = conv_w.reshape(K, C).astype(jnp.float32)
    logits = jnp.einsum("kc,ncs->nks", w, xf)
    a = jax.nn.softmax(logits, axis=1)
    vlad = (jnp.einsum("nks,ncs->nkc", a, xf)
            - jnp.sum(a, axis=2)[..., None] * centroids[None].astype(jnp.float32))
    vlad = vlad / jnp.maximum(jnp.linalg.norm(vlad, axis=2, keepdims=True), 1e-12)
    vlad = vlad.reshape(N, -1)
    return vlad / jnp.maximum(jnp.linalg.norm(vlad, axis=1, keepdims=True), 1e-12)


if __name__ == "__main__":
    # Small, module-consistent shapes: batch=2, dim=32, clusters=8.
    N, DIM, K = 2, 32, 8

    key = jax.random.PRNGKey(0)
    kx, kw, kc, kx2 = jax.random.split(key, 4)

    # nn.Conv2d(dim, num_clusters, 1, bias=False) weight: (K, DIM, 1, 1)
    conv_w = jax.random.normal(kw, (K, DIM, 1, 1), dtype=jnp.float32) * 0.1
    # nn.Parameter(torch.rand(num_clusters, dim)) -> uniform [0, 1)
    centroids = jax.random.uniform(kc, (K, DIM), dtype=jnp.float32)

    # Case 1: spatial 16x16 (S = 256, two lane-dense tiles -> exercises the
    # streamed accumulation), default fast bf16-MXU path.
    x1 = jax.random.normal(kx, (N, DIM, 16, 16), dtype=jnp.float32)
    vlad_fast = netvlad_forward(x1, conv_w, centroids, use_bf16_mxu=True)
    jax.block_until_ready(vlad_fast)
    assert vlad_fast.shape == (N, K * DIM)
    ref1 = netvlad_reference(x1, conv_w, centroids)
    err_fast = float(jnp.max(jnp.abs(vlad_fast.astype(jnp.float32) - ref1)))
    assert err_fast < 3e-2, f"fast-path max abs error vs reference: {err_fast}"

    # Case 2: spatial 15x15 (S = 225, not a multiple of 128 -> exercises the
    # zero-pad + lane-mask path), exact f32-MXU mode.
    x2 = jax.random.normal(kx2, (N, DIM, 15, 15), dtype=jnp.float32)
    vlad_exact = netvlad_forward(x2, conv_w, centroids, use_bf16_mxu=False)
    jax.block_until_ready(vlad_exact)
    assert vlad_exact.shape == (N, K * DIM)
    ref2 = netvlad_reference(x2, conv_w, centroids)
    err_exact = float(jnp.max(jnp.abs(vlad_exact.astype(jnp.float32) - ref2)))
    assert err_exact < 5e-3, f"exact-path max abs error vs reference: {err_exact}"

    print("KERNEL_OK")
</pallas_src>

<mosaic_0001>
module attributes {stable_mosaic.version = 11 : i64} {
  func.func @netvlad_kernel(%arg0: i32, %arg1: i32, %arg2: memref<1x32x256xf32, #tpu.memory_space<vmem>>, %arg3: memref<8x32xbf16, #tpu.memory_space<vmem>>, %arg4: memref<8x32xf32, #tpu.memory_space<vmem>>, %arg5: memref<1x8x32xf32, #tpu.memory_space<vmem>>, %arg6: memref<8x32xf32, #tpu.memory_space<vmem>>, %arg7: memref<8x1xf32, #tpu.memory_space<vmem>>) attributes {dimension_semantics = [#tpu.dimension_semantics<parallel>, #tpu.dimension_semantics<arbitrary>], iteration_bounds = array<i64: 2, 1>, scalar_prefetch = 0 : i64, scratch_operands = 2 : i64, tpu.core_type = #tpu.core_type<tc>, window_params = [{transform_indices = @transform_0, window_bounds = array<i64: 1, 32, 256>}, {pipeline_mode = #tpu.pipeline_mode<synchronous>, transform_indices = @transform_1, window_bounds = array<i64: 8, 32>}, {pipeline_mode = #tpu.pipeline_mode<synchronous>, transform_indices = @transform_2, window_bounds = array<i64: 8, 32>}, {transform_indices = @transform_3, window_bounds = array<i64: 1, 8, 32>}]} {
    %c0_i32 = arith.constant 0 : i32
    %0 = arith.cmpi eq, %arg1, %c0_i32 : i32
    %1 = arith.extui %0 : i1 to i32
    %c0_i32_0 = arith.constant 0 : i32
    %2 = arith.cmpi ne, %1, %c0_i32_0 : i32
    scf.if %2 {
      %cst_21 = arith.constant 0.000000e+00 : f32
      %39 = vector.broadcast %cst_21 : f32 to vector<8x32xf32>
      %c0_22 = arith.constant 0 : index
      %c0_23 = arith.constant 0 : index
      %40 = vector.load %arg6[%c0_22, %c0_23] : memref<8x32xf32, #tpu.memory_space<vmem>>, vector<8x32xf32>
      tpu.vector_store %arg6[%c0_22, %c0_23], %39 {strides = array<i32>} : memref<8x32xf32, #tpu.memory_space<vmem>>, vector<8x32xf32>,
      %cst_24 = arith.constant 0.000000e+00 : f32
      %41 = vector.broadcast %cst_24 : f32 to vector<8x1xf32>
      %c0_25 = arith.constant 0 : index
      %c0_26 = arith.constant 0 : index
      %42 = vector.load %arg7[%c0_25, %c0_26] : memref<8x1xf32, #tpu.memory_space<vmem>>, vector<8x1xf32>
      tpu.vector_store %arg7[%c0_25, %c0_26], %41 {strides = array<i32>} : memref<8x1xf32, #tpu.memory_space<vmem>>, vector<8x1xf32>,
    } else {
    }
    %c0 = arith.constant 0 : index
    %c0_1 = arith.constant 0 : index
    %c0_2 = arith.constant 0 : index
    %3 = vector.load %arg2[%c0, %c0_1, %c0_2] : memref<1x32x256xf32, #tpu.memory_space<vmem>>, vector<1x32x256xf32>
    %4 = vector.shape_cast %3 : vector<1x32x256xf32> to vector<32x256xf32>
    %5 = arith.mulf %4, %4 : vector<32x256xf32>
    %cst = arith.constant dense<0.000000e+00> : vector<256xf32>
    %6 = vector.multi_reduction <add>, %5, %cst [0] : vector<32x256xf32> to vector<256xf32>
    %7 = vector.shape_cast %6 : vector<256xf32> to vector<1x256xf32>
    %cst_3 = arith.constant 1.000000e-24 : f32
    %8 = vector.broadcast %cst_3 : f32 to vector<1x256xf32>
    %9 = arith.maximumf %7, %8 : vector<1x256xf32>
    %10 = math.rsqrt %9 : vector<1x256xf32>
    %11 = vector.broadcast %10 : vector<1x256xf32> to vector<32x256xf32>
    %12 = arith.mulf %4, %11 : vector<32x256xf32>
    %13 = arith.truncf %12 : vector<32x256xf32> to vector<32x256xbf16>
    %c0_4 = arith.constant 0 : index
    %c0_5 = arith.constant 0 : index
    %14 = vector.load %arg3[%c0_4, %c0_5] : memref<8x32xbf16, #tpu.memory_space<vmem>>, vector<8x32xbf16>
    %cst_6 = arith.constant dense<0.000000e+00> : vector<8x256xf32>
    %15 = tpu.matmul %14, %13, %cst_6 {dimension_numbers = #tpu.dot_dimension_numbers<[1], [0], [0], [1], [0, 0, 1, 1], [], []>} : vector<8x32xbf16>, vector<32x256xbf16>, vector<8x256xf32> -> vector<8x256xf32>
    %cst_7 = arith.constant dense<0xFF800000> : vector<256xf32>
    %16 = vector.multi_reduction <maximumf>, %15, %cst_7 [0] : vector<8x256xf32> to vector<256xf32>
    %17 = vector.shape_cast %16 : vector<256xf32> to vector<1x256xf32>
    %18 = vector.broadcast %17 : vector<1x256xf32> to vector<8x256xf32>
    %19 = arith.subf %15, %18 : vector<8x256xf32>
    %20 = math.exp %19 : vector<8x256xf32>
    %cst_8 = arith.constant dense<0.000000e+00> : vector<256xf32>
    %21 = vector.multi_reduction <add>, %20, %cst_8 [0] : vector<8x256xf32> to vector<256xf32>
    %22 = vector.shape_cast %21 : vector<256xf32> to vector<1x256xf32>
    %23 = tpu.reciprocal %22 {approx = true} : vector<1x256xf32> -> vector<1x256xf32>
    %24 = vector.broadcast %23 : vector<1x256xf32> to vector<8x256xf32>
    %25 = arith.mulf %20, %24 : vector<8x256xf32>
    %c0_9 = arith.constant 0 : index
    %c0_10 = arith.constant 0 : index
    %26 = vector.load %arg6[%c0_9, %c0_10] : memref<8x32xf32, #tpu.memory_space<vmem>>, vector<8x32xf32>
    %27 = arith.truncf %25 : vector<8x256xf32> to vector<8x256xbf16>
    %cst_11 = arith.constant dense<0.000000e+00> : vector<8x32xf32>
    %28 = tpu.matmul %27, %13, %cst_11 {dimension_numbers = #tpu.dot_dimension_numbers<[1], [1], [0], [0], [0, 0, 1, 0], [], []>} : vector<8x256xbf16>, vector<32x256xbf16>, vector<8x32xf32> -> vector<8x32xf32>
    %29 = arith.addf %26, %28 : vector<8x32xf32>
    %c0_12 = arith.constant 0 : index
    %c0_13 = arith.constant 0 : index
    %30 = vector.load %arg6[%c0_12, %c0_13] : memref<8x32xf32, #tpu.memory_space<vmem>>, vector<8x32xf32>
    tpu.vector_store %arg6[%c0_12, %c0_13], %29 {strides = array<i32>} : memref<8x32xf32, #tpu.memory_space<vmem>>, vector<8x32xf32>,
    %c0_14 = arith.constant 0 : index
    %c0_15 = arith.constant 0 : index
    %31 = vector.load %arg7[%c0_14, %c0_15] : memref<8x1xf32, #tpu.memory_space<vmem>>, vector<8x1xf32>
    %cst_16 = arith.constant dense<0.000000e+00> : vector<8xf32>
    %32 = vector.multi_reduction <add>, %25, %cst_16 [1] : vector<8x256xf32> to vector<8xf32>
    %33 = vector.shape_cast %32 : vector<8xf32> to vector<8x1xf32>
    %34 = arith.addf %31, %33 : vector<8x1xf32>
    %c0_17 = arith.constant 0 : index
    %c0_18 = arith.constant 0 : index
    %35 = vector.load %arg7[%c0_17, %c0_18] : memref<8x1xf32, #tpu.memory_space<vmem>>, vector<8x1xf32>
    tpu.vector_store %arg7[%c0_17, %c0_18], %34 {strides = array<i32>} : memref<8x1xf32, #tpu.memory_space<vmem>>, vector<8x1xf32>,
    %c0_i32_19 = arith.constant 0 : i32
    %36 = arith.cmpi eq, %arg1, %c0_i32_19 : i32
    %37 = arith.extui %36 : i1 to i32
    %c0_i32_20 = arith.constant 0 : i32
    %38 = arith.cmpi ne, %37, %c0_i32_20 : i32
    scf.if %38 {
      %c0_21 = arith.constant 0 : index
      %c0_22 = arith.constant 0 : index
      %39 = vector.load %arg6[%c0_21, %c0_22] : memref<8x32xf32, #tpu.memory_space<vmem>>, vector<8x32xf32>
      %c0_23 = arith.constant 0 : index
      %c0_24 = arith.constant 0 : index
      %40 = vector.load %arg7[%c0_23, %c0_24] : memref<8x1xf32, #tpu.memory_space<vmem>>, vector<8x1xf32>
      %c0_25 = arith.constant 0 : index
      %c0_26 = arith.constant 0 : index
      %41 = vector.load %arg4[%c0_25, %c0_26] : memref<8x32xf32, #tpu.memory_space<vmem>>, vector<8x32xf32>
      %42 = vector.broadcast %40 : vector<8x1xf32> to vector<8x32xf32>
      %43 = arith.mulf %42, %41 : vector<8x32xf32>
      %44 = arith.subf %39, %43 : vector<8x32xf32>
      %45 = arith.mulf %44, %44 : vector<8x32xf32>
      %cst_27 = arith.constant dense<0.000000e+00> : vector<8xf32>
      %46 = vector.multi_reduction <add>, %45, %cst_27 [1] : vector<8x32xf32> to vector<8xf32>
      %47 = vector.shape_cast %46 : vector<8xf32> to vector<8x1xf32>
      %cst_28 = arith.constant 1.000000e-24 : f32
      %48 = vector.broadcast %cst_28 : f32 to vector<8x1xf32>
      %49 = arith.maximumf %47, %48 : vector<8x1xf32>
      %50 = math.rsqrt %49 : vector<8x1xf32>
      %51 = vector.broadcast %50 : vector<8x1xf32> to vector<8x32xf32>
      %52 = arith.mulf %44, %51 : vector<8x32xf32>
      %53 = arith.mulf %52, %52 : vector<8x32xf32>
      %54 = vector.shape_cast %53 : vector<8x32xf32> to vector<1x8x32xf32>
      %cst_29 = arith.constant dense<0.000000e+00> : vector<1xf32>
      %55 = vector.multi_reduction <add>, %54, %cst_29 [1, 2] : vector<1x8x32xf32> to vector<1xf32>
      %56 = vector.shape_cast %55 : vector<1xf32> to vector<1x1x1xf32>
      %57 = vector.extract %56[0, 0, 0] : f32 from vector<1x1x1xf32>
      %cst_30 = arith.constant 1.000000e-24 : f32
      %58 = arith.maximumf %57, %cst_30 : f32
      %59 = math.rsqrt %58 : f32
      %60 = vector.broadcast %59 : f32 to vector<8x32xf32>
      %61 = arith.mulf %52, %60 : vector<8x32xf32>
      %c0_31 = arith.constant 0 : index
      %c0_32 = arith.constant 0 : index
      %c0_33 = arith.constant 0 : index
      %62 = vector.load %arg5[%c0_31, %c0_32, %c0_33] : memref<1x8x32xf32, #tpu.memory_space<vmem>>, vector<1x8x32xf32>
      %63 = vector.shape_cast %62 : vector<1x8x32xf32> to vector<8x32xf32>
      %64 = vector.shape_cast %61 : vector<8x32xf32> to vector<1x8x32xf32>
      tpu.vector_store %arg5[%c0_31, %c0_32, %c0_33], %64 {strides = array<i32>} : memref<1x8x32xf32, #tpu.memory_space<vmem>>, vector<1x8x32xf32>,
    } else {
    }
    return
  }
  func.func @transform_0(%arg0: i32, %arg1: i32) -> (i32, i32, i32) {
    %c0_i32 = arith.constant 0 : i32
    %c0_i32_0 = arith.constant 0 : i32
    return %arg0, %c0_i32, %arg1 : i32, i32, i32
  }
  func.func @transform_1(%arg0: i32, %arg1: i32) -> (i32, i32) {
    %c0_i32 = arith.constant 0 : i32
    %c0_i32_0 = arith.constant 0 : i32
    %c0_i32_1 = arith.constant 0 : i32
    return %c0_i32, %c0_i32_0 : i32, i32
  }
  func.func @transform_2(%arg0: i32, %arg1: i32) -> (i32, i32) {
    %c0_i32 = arith.constant 0 : i32
    %c0_i32_0 = arith.constant 0 : i32
    %c0_i32_1 = arith.constant 0 : i32
    return %c0_i32, %c0_i32_0 : i32, i32
  }
  func.func @transform_3(%arg0: i32, %arg1: i32) -> (i32, i32, i32) {
    %c0_i32 = arith.constant 0 : i32
    %c0_i32_0 = arith.constant 0 : i32
    %c0_i32_1 = arith.constant 0 : i32
    return %arg0, %c0_i32, %c0_i32_0 : i32, i32, i32
  }
}

</mosaic_0001>

<bundles_post_ra>
// kernel: tpu_custom_call.1
= control target key start
LH: loop header
LB: loop body
LE: loop exit
PB: predicated region body
PF: predicated region fallthrough
CT: control target
= control target key end

     0   :  { %8 = vsyncpa [#allocation5], 0  ;;  %s1161_s0 = inlined_call_operand.hbm [shape: f32[2,32,256], index: 0, kind: input, shape index: {}]   ;;  %s1162_s1 = inlined_call_operand.hbm [shape: bf16[8,32], index: 1, kind: input, shape index: {}]   ;;  %s1163_s2 = inlined_call_operand.hbm [shape: f32[8,32], index: 2, kind: input, shape index: {}]   ;;  %s1164_s3 = inlined_call_operand.hbm [shape: f32[2,8,32], index: 3, kind: output, shape index: {}]  }
   0x1   :  { %10 = vsyncpa [#allocation5 + $0x1], 0 }
   0x2   :  { %11 = vsyncpa [#allocation8], 0 }
   0x3   :  { %12 = vsyncpa [#allocation6], 0 }
   0x4   :  { %14 = vsyncpa [#allocation6 + $0x1], 0  ;;  %s906_s12 = smov 0   ;;  %s908_s13 = smov 0  }
   0x5   :  { %s910_s14 = smov 0   ;;  %s912_s15 = smov 0  }
   0x6   :  { %s914_s16 = smov 0   ;;  %s916_s17 = smov 0  }
   0x7 LB: > { %s574_s18 = sadd.s32 4294967295, %s875_s17   ;;  %s575_s19 = sadd.s32 4294967294, %s875_s17   ;;  %s875_s17 = sphi %s916_s17, %s20_s17   ;;  %s871_s16 = sphi %s914_s16, %s1190_s16   ;;  %s867_s15 = sphi %s912_s15, %s1189_s15   ;;  %s863_s14 = sphi %s910_s14, %s1188_s14   ;;  %s859_s13 = sphi %s908_s13, %s1187_s13   ;;  %s855_s12 = sphi %s906_s12, %s1186_s12  }
   0x8   : > { %s41_s20 = sadd.s32 1, %s863_s14  ;;  %p48_p0 = scmp.ne.s32.totalorder %s863_s14, %s859_s13 }
   0x9   : > { %p49_p1 = scmp.eq.s32.totalorder %s875_s17, 0  ;;  %p54_p2 = scmp.ne.s32.totalorder %s859_s13, %s855_s12 }
   0xa   : > { %p944_p3 = scmp.eq.s32.totalorder %s574_s18, 0  ;;  %p120_p4 = scmp.eq.s32.totalorder %s574_s18, 1 }
   0xb   : > { %p948_p5 = por %p49_p1, %p48_p0  ;;  %p126_p6 = scmp.eq.s32.totalorder %s575_s19, 1 }
   0xc   : > { %s1171_s21 = scalar_select %p944_p3, 1, 0 }
   0xd   : > { %p954_p7 = por %p944_p3, %p54_p2  ;;  %p958_p8 = por %p120_p4, %p48_p0 }
   0xe   : > { %p962_p9 = por %p126_p6, %p54_p2  ;;  %p576_p10 = scmp.ge.s32.totalorder %s875_s17, 1 }
   0xf   : > { %s1173_s23 = scalar_select %p954_p7, 1, 0 }
  0x10   : > { %s1174_s24 = scalar_select %p958_p8, 1, 0 }
  0x11   : > { %s1175_s25 = scalar_select %p962_p9, 1, 0 }
  0x12   : > { %p133_p11 = scmp.lt.s32.totalorder %s875_s17, 3  ;;  %s877_s27 = smov [#allocation7]  }
  0x13   : > { %s146_s28 = sshll.u32 %s877_s27, 4  ;;  %p627_p1 = scmp.lt.s32.totalorder %s875_s17, 2  ;;  %s147_s28 = int_to_ptr.vmem [resolvable:$true] %s146_s28 }
  0x14   : > { %p969_p13 = pnand %p576_p10, %p133_p11  ;;  %s878_s30 = smov [#allocation9]  }
  0x15   : > { %p978_p4 = pnand %p627_p1, %p948_p5  ;;  %s157_s4 = sshll.u32 %s878_s30, 4  ;;  %s988_s4 = int_to_ptr.vmem [resolvable:$true] %s157_s4 }
  0x16   : > { %s1176_s26 = scalar_select %p969_p13, 1, 0 }
  0x17   : > { %p610_p0 = pneg %p969_p13  ;;  %s703_s8 = scalar_lea.hbm %s1162_s1, 64 }
  0x18   : > { %s1177_s29 = scalar_select %p978_p4, 1, 0 }
  0x19   : > { %p984_p2 = pnand %p610_p0, %p944_p3  ;;  %p704_p5 = scmp.ne.s32.totalorder %s1162_s1, %s703_s8 }
  0x1a   : > { %p710_p1 = scmp.lt.u32.totalorder %s703_s8, %s1162_s1 }
  0x1b   : > { %p705_p6 = pneg %p984_p2 }
  0x1d   : > { %p706_p10 = pnand %p705_p6, %p704_p5 }
  0x1f   : > { %p707_p11 = pneg %p706_p10 }
  0x21   : > { %p712_p0 = pnand %p710_p1, %p707_p11 }
  0x23   : > { %715 = shalt.err (!%p712_p0)
}
  0x24   : > { %s716_s19 = scalar_lea.vmem %s147_s28, 64  ;;  %p724_p3 = scmp.lt.s32.totalorder %s147_s28, %s147_s28 }
  0x25   : > { %p717_p12 = scmp.ne.s32.totalorder %s147_s28, %s716_s19  ;;  %p725_p7 = scmp.lt.s32.totalorder %s716_s19, %s716_s19 }
  0x27   : > { %p719_p9 = pnand %p717_p12, %p705_p6  ;;  %p726_p13 = por %p725_p7, %p724_p3 }
  0x29   : > { %p720_p8 = pneg %p719_p9 }
  0x2b   : > { %p727_p4 = pnand %p726_p13, %p720_p8 }
  0x2d   : > { %730 = shalt.err (!%p727_p4)
}
  0x2e   : > { %613 = dma.hbm_to_vmem [thread:$0]  (!%p984_p2), %s1162_s1, 64, %s147_s28, [#allocation8]  }
  0x2f   : > { %s731_s7 = scalar_lea.hbm %s1163_s2, 128 }
  0x30   : > { %p732_p9 = scmp.ne.s32.totalorder %s1163_s2, %s731_s7  ;;  %p738_p8 = scmp.lt.u32.totalorder %s731_s7, %s1163_s2 }
  0x32   : > { %p734_p3 = pnand %p732_p9, %p705_p6 }
  0x34   : > { %p735_p7 = pneg %p734_p3 }
  0x36   : > { %p740_p12 = pnand %p738_p8, %p735_p7 }
  0x38   : > { %743 = shalt.err (!%p740_p12)
}
  0x39   : > { %s744_s28 = scalar_lea.vmem %s988_s4, 128  ;;  %p752_p10 = scmp.lt.s32.totalorder %s988_s4, %s988_s4 }
  0x3a   : > { %p745_p13 = scmp.ne.s32.totalorder %s988_s4, %s744_s28  ;;  %p753_p11 = scmp.lt.s32.totalorder %s744_s28, %s744_s28 }
  0x3c   : > { %p747_p4 = pnand %p745_p13, %p705_p6  ;;  %p754_p1 = por %p753_p11, %p752_p10 }
  0x3e   : > { %p748_p5 = pneg %p747_p4 }
  0x40   : > { %p755_p0 = pnand %p754_p1, %p748_p5 }
  0x42   : > { %758 = shalt.err (!%p755_p0)
}
  0x43   : > { %616 = dma.hbm_to_vmem [thread:$0]  (!%p984_p2), %s1163_s2, 128, %s988_s4, [#allocation8]  }
  0x44   : > { %s32_s22 = sadd.s32 1, %s871_s16  ;;  %s168_s27 = sand.u32 1, %s863_s14  }
  0x45   : > { %p34_p6 = scmp.ge.s32.totalorder %s32_s22, 2  ;;  %s580_s30 = sshll.u32 %s168_s27, 6 }
  0x46   : > { %s593_s6 = sshll.u32 %s871_s16, 10  ;;  %s172_s4 = scalar_lea.vmem [#allocation4], %s580_s30 }
  0x47   : > { %s1192_s22 = smov (%p34_p6, %s32_s22), 0  ;;  %s1045_s8 = scalar_lea.hbm %s1161_s0, %s593_s6 }
  0x48   : > { %s36_s9 = ssub.s32 %s871_s16, %s1192_s22  ;;  %s181_s10 = sshll.u32 %s172_s4, 4  ;;  %s1049_s10 = int_to_ptr.vmem [resolvable:$true] %s181_s10 }
  0x49   : > { %p39_p2 = scmp.eq.s32.totalorder %s36_s9, 0  ;;  %s1056_s28 = scalar_lea.sflag [#allocation5], %s168_s27 }
  0x4a   : > { %s759_s18 = scalar_lea.hbm %s1045_s8, 1024  ;;  %p1179_p3 = scmp.ne.s32.totalorder %s1177_s29, 0 }
  0x4b   : > { %s1054_s11 = scalar_select %p39_p2, %s863_s14, %s41_s20  }
  0x4c   : > { %p760_p9 = scmp.ne.s32.totalorder %s1045_s8, %s759_s18  ;;  %p761_p7 = pneg %p1179_p3 }
  0x4d   : > { %s764_s30 = scalar_lea.hbm %s1161_s0, 2048  ;;  %p765_p13 = scmp.lt.u32.totalorder %s1045_s8, %s1161_s0 }
  0x4e   : > { %p762_p8 = pnand %p761_p7, %p760_p9  ;;  %p766_p4 = scmp.lt.u32.totalorder %s764_s30, %s759_s18 }
  0x4f   : > { %p768_p10 = scmp.lt.u32.totalorder %s759_s18, %s1045_s8 }
  0x50   : > { %p763_p12 = pneg %p762_p8  ;;  %p767_p5 = por %p766_p4, %p765_p13 }
  0x52   : > { %p769_p11 = por %p768_p10, %p767_p5 }
  0x54   : > { %p770_p1 = pnand %p769_p11, %p763_p12 }
  0x56   : > { %773 = shalt.err (!%p770_p1)
}
  0x57   : > { %s774_s20 = scalar_lea.vmem %s1049_s10, 1024  ;;  %s879_s27 = smov [#allocation4]  }
  0x58   : > { %p775_p0 = scmp.ne.s32.totalorder %s1049_s10, %s774_s20  ;;  %s779_s9 = sshll.u32 %s879_s27, 4  ;;  %s780_s9 = int_to_ptr.vmem [resolvable:$false] %s779_s9 }
  0x59   : > { %s781_s4 = scalar_lea.vmem %s780_s9, 2048  ;;  %p782_p9 = scmp.lt.s32.totalorder %s1049_s10, %s780_s9 }
  0x5a   : > { %p777_p6 = pnand %p775_p0, %p761_p7  ;;  %p783_p8 = scmp.lt.s32.totalorder %s781_s4, %s774_s20 }
  0x5c   : > { %p778_p2 = pneg %p777_p6  ;;  %p784_p13 = por %p783_p8, %p782_p9 }
  0x5e   : > { %p785_p4 = pnand %p784_p13, %p778_p2 }
  0x60   : > { %788 = shalt.err (!%p785_p4)
}
  0x61   : > { %s880_s18 = smov 256   ;;  %s881_s19 = smov 16  }
  0x62   : > { %620 = dma.hbm_to_vmem [thread:$0]  (!%p1179_p3), %s1045_s8, 1024, %s1049_s10, %s1056_s28, %s880_s18, %s880_s18, %s881_s19  }
  0x63   : > { %p1180_p7 = scmp.ne.s32.totalorder %s1176_s26, 0 }
  0x64   : > { %s1087_s6 = sand.u32 (!%p1180_p7), 1, %s859_s13   ;;  %p1181_p12 = scmp.ne.s32.totalorder (!%p1180_p7), %s1173_s23, 0 }
  0x65   : > { %193 = sbr.rel (%p1180_p7) target bundleno = 1157 (0x485), region = 32  ;;  %s584_s30 = sshll.u32 (!%p1180_p7), %s1087_s6, 6 }
  0x66   : > { %s196_s5 = scalar_lea.sflag (!%p1180_p7), [#allocation5], %s1087_s6  ;;  %s199_s7 = scalar_lea.vmem (!%p1180_p7), [#allocation4], %s584_s30 }
  0x6c   : > { %842 = dma.done.wait (%p1181_p12), %s196_s5, 1024  }
  0x6d   : > { %844 = vsyncadd (%p1181_p12), %s196_s5, 4294966272  ;;  %p1182_p5 = scmp.ne.s32.totalorder %s1171_s21, 0 }
  0x6f   : > { %846 = dma.done.wait (%p1182_p5), [#allocation8], 192  }
  0x70   : > { %848 = vsyncadd (%p1182_p5), [#allocation8], 4294967104  ;;  %v882_v0 = vmov 0   ;;  %v241_v1 = vld [vmem:[%s199_s7 + $0x8] sm:$0xff]  ;;  %v243_v2 = vld [vmem:[%s199_s7 + $0x18] sm:$0xff]  ;;  %vm236_vm0 = vcmask 261120  }
  0x71   : > { %327 = vmatprep.mubr.bf16.mxu0 %v882_v0  ;;  %686 = vset.pattern.permute.xlu0 %v882_v0  ;;  %v245_v3 = vld [vmem:[%s199_s7 + $0x28] sm:$0xff]  ;;  %v247_v4 = vld [vmem:[%s199_s7 + $0x38] sm:$0xff]  ;;  %v249_v5 = vmul.f32 %v241_v1, %v241_v1  ;;  %v251_v6 = vmul.f32 %v243_v2, %v243_v2  ;;  %v240_v8 = vld [vmem:[%s199_s7] sm:$0xff]  ;;  %vm238_vm1 = vcmask 7168   ;;  %v883_v52 = vmov 0.0   ;;  %s587_s29 = sshll.u32 %s1087_s6, 3 }
  0x72   : > { %v253_v7 = vmul.f32 %v245_v3, %v245_v3  ;;  %v242_v9 = vld [vmem:[%s199_s7 + $0x10] sm:$0xff]  ;;  %v244_v10 = vld [vmem:[%s199_s7 + $0x20] sm:$0xff]  ;;  %v248_v12 = vmul.f32 %v240_v8, %v240_v8  ;;  %v255_v14 = vmul.f32 %v247_v4, %v247_v4  ;;  %239 = vst.msk [vmem:[#allocation3] sm:$0xff] %vm238_vm1, %v883_v52  ;;  %s884_s23 = smov 1e-24   ;;  %s590_s8 = sshll.u32 %s867_s15, 7 }
  0x73   : > { %v246_v11 = vld [vmem:[%s199_s7 + $0x30] sm:$0xff]  ;;  %v250_v13 = vmul.f32 %v242_v9, %v242_v9  ;;  %v265_v15 = vadd.f32 %v251_v6, %v249_v5  ;;  %v252_v16 = vmul.f32 %v244_v10, %v244_v10  ;;  %v290_v51 = vld [vmem:[#allocation7] sm:$0xf]  ;;  %237 = vst.msk [vmem:[#allocation2] sm:$0xff] %vm236_vm0, %v883_v52  ;;  %s229_s10 = scalar_lea.vmem [#allocation10], %s587_s29  ;;  %s1111_s4 = scalar_lea.hbm %s1164_s3, %s590_s8 }
  0x74   : > { %v254_v17 = vmul.f32 %v246_v11, %v246_v11  ;;  %s474_s28 = sshll.u32 %s229_s10, 4  ;;  %s461_s18 = scalar_lea.sflag [#allocation6], %s1087_s6  ;;  %s1113_s28 = int_to_ptr.vmem [resolvable:$true] %s474_s28 }
  0x75   : > { %v256_v18 = vadd.f32 %v250_v13, %v248_v12  ;;  %v266_v19 = vadd.f32 %v265_v15, %v253_v7  ;;  %s789_s19 = scalar_lea.vmem %s1113_s28, 128  ;;  %p1183_p10 = scmp.ne.s32.totalorder %s1174_s24, 0 }
  0x76   : > { %p790_p3 = scmp.ne.s32.totalorder %s1113_s28, %s789_s19  ;;  %s885_s15 = smov [#allocation10]  }
  0x77   : > { %v257_v20 = vadd.f32 %v256_v18, %v252_v16  ;;  %v267_v21 = vadd.f32 %v266_v19, %v255_v14  ;;  %s793_s30 = sshll.u32 %s885_s15, 4  ;;  %s794_s30 = int_to_ptr.vmem [resolvable:$false] %s793_s30 }
  0x78   : > { %p791_p11 = pnand %p790_p3, %p1183_p10  ;;  %s795_s5 = scalar_lea.vmem %s794_s30, 256 }
  0x79   : > { %v258_v22 = vadd.f32 %v257_v20, %v254_v17  ;;  %v268_v23 = vrot.slane %v267_v21, 4  ;;  %p796_p0 = scmp.lt.s32.totalorder %s1113_s28, %s794_s30  ;;  %p797_p6 = scmp.lt.s32.totalorder %s795_s5, %s789_s19 }
  0x7a   : > { %p792_p1 = pneg %p791_p11 }
  0x7b   : > { %v259_v24 = vrot.slane %v258_v22, 4  ;;  %v269_v25 = vadd.f32 %v268_v23, %v267_v21  ;;  %p798_p2 = por %p797_p6, %p796_p0 }
  0x7d   : > { %v260_v26 = vadd.f32 %v259_v24, %v258_v22  ;;  %v270_v27 = vrot.slane %v269_v25, 2  ;;  %p799_p9 = pnand %p798_p2, %p792_p1 }
  0x7f   : > { %v261_v28 = vrot.slane %v260_v26, 2  ;;  %v271_v29 = vadd.f32 %v270_v27, %v269_v25 }
  0x81   : > { %v262_v30 = vadd.f32 %v261_v28, %v260_v26  ;;  %v272_v31 = vrot.slane %v271_v29, 1 }
  0x83   : > { %v263_v32 = vrot.slane %v262_v30, 1  ;;  %v273_v33 = vadd.f32 %v272_v31, %v271_v29 }
  0x85   : > { %v264_v34 = vadd.f32 %v263_v32, %v262_v30  ;;  %v275_v35 = vmax.f32 %v273_v33, 1e-24  ;;  %v415_v30 = vld [vmem:[#allocation3] sm:$0xff] }
  0x87   : > { %v274_v36 = vmax.f32 %v264_v34, 1e-24  ;;  %687 = vrsqrt.f32 %v275_v35  ;;  %v370_v34 = vld [vmem:[#allocation2] sm:$0xff] }
  0x89   : > { %689 = vrsqrt.f32 %v274_v36 }
  0x91   : > { %v688_v37 = vpop.eup %687 }
  0x92   : > { %v279_v39 = vmul.f32 %v688_v37, %v241_v1  ;;  %v281_v40 = vmul.f32 %v688_v37, %v243_v2  ;;  %v283_v41 = vmul.f32 %v688_v37, %v245_v3  ;;  %v285_v42 = vmul.f32 %v688_v37, %v247_v4 }
  0x93   : > { %v690_v38 = vpop.eup %689 }
  0x94   : > { %v278_v43 = vmul.f32 %v690_v38, %v240_v8  ;;  %v280_v44 = vmul.f32 %v690_v38, %v242_v9  ;;  %v282_v45 = vmul.f32 %v690_v38, %v244_v10  ;;  %v284_v46 = vmul.f32 %v690_v38, %v246_v11 }
  0x95   : > { %v287_v47 = vpack.c.bf16 %v281_v40, %v279_v39  ;;  %v289_v48 = vpack.c.bf16 %v285_v42, %v283_v41  ;;  %v427_v40 = vld [vmem:[#allocation9] sm:$0xff] }
  0x96   : > { %v286_v49 = vpack.c.bf16 %v280_v44, %v278_v43  ;;  %v288_v50 = vpack.c.bf16 %v284_v46, %v282_v45 }
  0x97   : > { %295 = vmatprep.subr.bf16.mxu0 %v287_v47  ;;  %373 = vmatprep.subr.bf16.mxu1 %v287_v47 }
  0x98   : > { %296 = vmatpush1.bf16.msra.mxu0 %v286_v49  ;;  %374 = vmatpush1.bf16.xpose.msra.mxu1 %v286_v49 }
  0x99   : > { %297 = vmatprep.subr.bf16.mxu0 %v289_v48  ;;  %375 = vmatprep.subr.bf16.mxu1 %v289_v48 }
  0x9c   : > { %298 = vmatpush1.bf16.msra.mxu0 %v288_v50 }
  0x9f   : > { %588 = vmatmul.mubr.msk.bf16.vlgmr.msra.gmra.mrb[0].mxu0 %vm236_vm0, %v290_v51 }
  0xa0   : > { %376 = vmatpush1.bf16.xpose.msra.mxu1 %v288_v50 }
 0x172   : > { %v329_v53 = vpop.f32.mrb[0].mxu0 }
 0x173   : > { %v336_v54 = vrot.slane %v329_v53, 4  ;;  %v331_v55 = vpop.f32.mrb[1].mxu0 }
 0x174   : > { %v342_v56 = vrot.slane %v331_v55, 4  ;;  %v333_v57 = vpop.f32.mrb[2].mxu0 }
 0x175   : > { %v337_v58 = vmax.f32 %v329_v53, %v336_v54  ;;  %v334_v59 = vpop.f32.mrb[3].mxu0 }
 0x176   : > { %v343_v60 = vmax.f32 %v331_v55, %v342_v56 }
 0x177   : > { %v338_v61 = vrot.slane %v337_v58, 2 }
 0x178   : > { %v344_v62 = vrot.slane %v343_v60, 2 }
 0x179   : > { %v339_v63 = vmax.f32 %v337_v58, %v338_v61 }
 0x17a   : > { %v345_v0 = vmax.f32 %v343_v60, %v344_v62 }
 0x17b   : > { %v340_v1 = vrot.slane %v339_v63, 1 }
 0x17c   : > { %v346_v2 = vrot.slane %v345_v0, 1 }
 0x17d   : > { %v341_v3 = vmax.f32 %v339_v63, %v340_v1 }
 0x17e   : > { %v347_v4 = vmax.f32 %v345_v0, %v346_v2 }
 0x17f   : > { %v348_v5 = vsub.f32 %v329_v53, %v341_v3 }
 0x180   : > { %v349_v6 = vsub.f32 %v331_v55, %v347_v4 }
 0x181   : > { %v350_v7 = vmul.f32 1.442695, %v348_v5 }
 0x182   : > { %v352_v8 = vmul.f32 1.442695, %v349_v6 }
 0x183   : > { %691 = vpow2.f32 %v350_v7 }
 0x184   : > { %693 = vpow2.f32 %v352_v8 }
 0x18d   : > { %v692_v9 = vpop.eup %691 }
 0x18e   : > { %v694_v10 = vpop.eup %693  ;;  %v354_v11 = vrot.slane %v692_v9, 4 }
 0x18f   : > { %v360_v12 = vrot.slane %v694_v10, 4 }
 0x190   : > { %v355_v13 = vadd.f32 %v692_v9, %v354_v11 }
 0x191   : > { %v361_v14 = vadd.f32 %v694_v10, %v360_v12 }
 0x192   : > { %v356_v15 = vrot.slane %v355_v13, 2 }
 0x193   : > { %v362_v16 = vrot.slane %v361_v14, 2 }
 0x194   : > { %v357_v17 = vadd.f32 %v356_v15, %v355_v13 }
 0x195   : > { %v363_v18 = vadd.f32 %v362_v16, %v361_v14 }
 0x196   : > { %v358_v19 = vrot.slane %v357_v17, 1 }
 0x197   : > { %v364_v20 = vrot.slane %v363_v18, 1 }
 0x198   : > { %v359_v21 = vadd.f32 %v358_v19, %v357_v17 }
 0x199   : > { %v365_v22 = vadd.f32 %v364_v20, %v363_v18 }
 0x19a   : > { %695 = vrcp.f32 %v359_v21 }
 0x19b   : > { %697 = vrcp.f32 %v365_v22 }
 0x1a4   : > { %v696_v23 = vpop.eup %695 }
 0x1a5   : > { %v698_v24 = vpop.eup %697  ;;  %v368_v25 = vmul.f32 %v696_v23, %v692_v9 }
 0x1a6   : > { %v369_v26 = vmul.f32 %v698_v24, %v694_v10 }
 0x1a7   : > { %v371_v29 = vpack.c.bf16 %v368_v25, %v368_v25 }
 0x1a8   : > { %v416_v27 = vadd.f32 %v369_v26, %v368_v25  ;;  %v372_v28 = vpack.c.bf16 %v369_v26, %v369_v26 }
 0x1aa   : > { %417 = vadd.xlane.f32.xlu0 %v416_v27  ;;  %405 = vmatprep.mubr.bf16.mxu1 %v372_v28 }
 0x1ab   : > { %406 = vmatmul.mubr.bf16.vlgmr.msra.gmra.mrb[0].mxu1 %v371_v29 }
 0x237   : > { %v418_v31 = vpop.xlane.xlu0 %417 }
 0x238   : > { %v419_v32 = vadd.f32 %v418_v31, %v415_v30 }
 0x23a   : > { %421 = vst.msk [vmem:[#allocation3] sm:$0xff] %vm238_vm1, %v419_v32 }
 0x241   : > { %v426_v33 = vld [vmem:[#allocation3] sm:$0xff] }
 0x242   : > { %430 = vperm.xlu0 %686, %v426_v33  }
 0x27e   : > { %v407_v35 = vpop.f32.mrb[0].mxu1 }
 0x27f   : > { %v413_v36 = vadd.f32 %v407_v35, %v370_v34  ;;  %v409_v37 = vpop.f32.mrb[1].mxu1 }
 0x280   : > { %v410_v38 = vpop.f32.mrb[2].mxu1 }
 0x281   : > { %414 = vst.msk [vmem:[#allocation2] sm:$0xff] %vm236_vm0, %v413_v36  ;;  %v411_v39 = vpop.f32.mrb[3].mxu1 }
 0x288   : > { %v425_v43 = vld [vmem:[#allocation2] sm:$0xff] }
 0x2c1   : > { %v431_v41 = vpop.permute.xlu0 %430 }
 0x2c2   : > { %v433_v42 = vmul.f32 %v431_v41, %v427_v40 }
 0x2c4   : > { %v434_v44 = vsub.f32 %v425_v43, %v433_v42 }
 0x2c6   : > { %v435_v45 = vmul.f32 %v434_v44, %v434_v44 }
 0x2c8   : > { %v436_v46 = vsel %vm236_vm0, %v435_v45, 0.0 }
 0x2c9   : > { %437 = vadd.xlane.f32.xlu1 %v436_v46 }
 0x356   : > { %v438_v47 = vpop.xlane.xlu1 %437 }
 0x357   : > { %v439_v48 = vmax.f32 %v438_v47, 1e-24 }
 0x359   : > { %699 = vrsqrt.f32 %v439_v48 }
 0x363   : > { %v700_v49 = vpop.eup %699 }
 0x364   : > { %v441_v50 = vmul.f32 %v700_v49, %v434_v44 }
 0x366   : > { %v442_v51 = vmul.f32 %v441_v50, %v441_v50 }
 0x368   : > { %v443_v52 = vsel %vm236_vm0, %v442_v51, 0.0 }
 0x369   : > { %444 = vadd.xlane.f32.xlu1 %v443_v52 }
 0x3f6   : > { %v445_v53 = vpop.xlane.xlu1 %444 }
 0x3f7   : > { %v446_v54 = vrot.slane %v445_v53, 4 }
 0x3f9   : > { %v447_v55 = vadd.f32 %v446_v54, %v445_v53 }
 0x3fb   : > { %v448_v56 = vrot.slane %v447_v55, 2 }
 0x3fd   : > { %v449_v57 = vadd.f32 %v448_v56, %v447_v55 }
 0x3ff   : > { %v450_v58 = vrot.slane %v449_v57, 1 }
 0x401   : > { %v451_v59 = vadd.f32 %v450_v58, %v449_v57 }
 0x403   : > { %594 = vpush %v451_v59 }
 0x434   : > { %s595_s21 = spop %594 }
 0x435   : > { %s453_s26 = smax.f32 %s884_s23, %s595_s21 }
 0x436   : > { %v454_v60 = vstv %s453_s26 }
 0x437   : > { %701 = vrsqrt.f32 %v454_v60 }
 0x441   : > { %v702_v61 = vpop.eup %701 }
 0x442   : > { %596 = vpush %v702_v61 }
 0x473   : > { %s597_s20 = spop %596 }
 0x474   : > { %v457_v62 = vstv %s597_s20 }
 0x475   : > { %v458_v63 = vmul.f32 %v457_v62, %v441_v50 }
 0x477   : > { %459 = vst.msk [vmem:[%s229_s10] sm:$0xff] %vm236_vm0, %v458_v63 }
 0x478   : > { %802 = shalt.err (!%p799_p9)
}
 0x479   : > { %s803_s6 = scalar_lea.hbm %s1111_s4, 128  ;;  %s807_s23 = scalar_lea.hbm %s1164_s3, 256 }
 0x47a   : > { %p804_p8 = scmp.ne.s32.totalorder %s1111_s4, %s803_s6  ;;  %p808_p7 = scmp.lt.u32.totalorder %s1111_s4, %s1164_s3 }
 0x47b   : > { %p809_p12 = scmp.lt.u32.totalorder %s807_s23, %s803_s6  ;;  %p811_p3 = scmp.lt.u32.totalorder %s803_s6, %s1111_s4 }
 0x47c   : > { %p805_p13 = pnand %p804_p8, %p1183_p10 }
 0x47d   : > { %p810_p5 = por %p809_p12, %p808_p7 }
 0x47e   : > { %p806_p4 = pneg %p805_p13 }
 0x47f   : > { %p812_p11 = por %p811_p3, %p810_p5 }
 0x481   : > { %p813_p1 = pnand %p812_p11, %p806_p4 }
 0x483   : > { %816 = shalt.err (!%p813_p1)
}
 0x484   : > { %608 = dma.vmem_to_hbm [thread:$0]  (%p1183_p10), %s1113_s28, 128, %s1111_s4, %s461_s18  }
 0x485 PF: > { %s486_s8 = sand.u32 1, %s855_s12   ;;  %p1184_p0 = scmp.ne.s32.totalorder %s1175_s25, 0 }
 0x486   : > { %p1185_p6 = scmp.ge.s32.totalorder %s875_s17, 2  ;;  %s487_s10 = scalar_lea.sflag [#allocation6], %s486_s8 }
 0x488   : > { %p622_p2 = pnand %p1185_p6, %p1184_p0 }
 0x48a   : > { %850 = dma.done.wait (!%p622_p2), %s487_s10, 128  }
 0x48b   : > { %852 = vsyncadd (!%p622_p2), %s487_s10, 4294967168  ;;  %s20_s17 = sadd.s32 1, %s875_s17   ;;  %s1186_s12 = smov %s859_s13 }
 0x48c   : > { %p17_p9 = scmp.ge.s32.totalorder %s20_s17, 4   ;;  %s1187_s13 = smov %s863_s14 }
 0x48d   : > { %s1188_s14 = smov %s1054_s11  ;;  %s1189_s15 = smov %s871_s16 }
 0x48e   : > { %s1190_s16 = smov %s1192_s22  ;;  %19 = sbr.rel (!%p17_p9) target bundleno = 7 (0x7), region = 93 }
 0x495   :  { %492 = vsyncpa [#allocation5], 1 }
 0x496   :  { %494 = vsyncpa [#allocation5 + $0x1], 1 }
 0x497   :  { %495 = vsyncpa [#allocation8], 1 }
 0x498   :  { %496 = vsyncpa [#allocation6], 1 }
 0x499   :  { %498 = vsyncpa [#allocation6 + $0x1], 1 }

</bundles_post_ra>
